<compile_context>
chip_gen: v7x
topology: tpu7x:2x2x1
jax: 0.10.0
libtpu: 0.0.40
codegen_flags: <defaults>
</compile_context>

<pallas_src>
import functools

import jax
import jax.numpy as jnp
from jax.experimental import pallas as pl
from jax.experimental.pallas import tpu as pltpu

LANE = 128     # TPU lane width
SUBLANE = 8    # f32 sublane height


def _round_up(n, m):
    return ((n + m - 1) // m) * m


def qnetwork_kernel(xa_ref, w1_ref, b1_ref, w2_ref, b2_ref, w3_ref, b3_ref, o_ref):
    """One batch tile of the critic: relu(fc1) -> relu(fc2) -> fc3.

    xa_ref : [TB, K_pad] bf16   concat([obs, act]) zero-padded to 128 lanes
    w1_ref : [K_pad, H]  bf16   (VMEM-resident across grid steps)
    w2_ref : [H, H]      bf16
    w3_ref : [1, H]      f32    fc3 weight as a lane-dense row (no padding)
    b1,b2  : [1, H]      f32
    b3_ref : [1, 1]      f32    SMEM scalar
    o_ref  : [TB, 1]     f32    q(s, a) per row (no 128-wide padding / writeback)
    """
    # fc1 (concat already folded into a single 128-lane-aligned matmul) -> f32 acc, ReLU.
    h1 = jnp.dot(xa_ref[...], w1_ref[...], preferred_element_type=jnp.float32)
    h1 = jnp.maximum(h1 + b1_ref[...], 0.0)

    # fc2: bf16 MXU matmul, f32 bias + ReLU.
    h2 = jnp.dot(h1.astype(jnp.bfloat16), w2_ref[...],
                 preferred_element_type=jnp.float32)
    h2 = jnp.maximum(h2 + b2_ref[...], 0.0)

    # fc3: single output column -> VPU multiply by the w3 row + XLU lane reduction
    # (both units have slack here); avoids a mostly-zero MXU push and a 128-wide store.
    q = jnp.sum(h2 * w3_ref[...], axis=-1, keepdims=True) + b3_ref[0, 0]
    o_ref[...] = q


@functools.partial(jax.jit, static_argnames=("tile_b",))
def qnetwork_forward(x, a, params, tile_b=2048):
    """x: [B, obs_dim] f32, a: [B, act_dim] f32 -> q: [B, 1] f32."""
    w1, b1, w2, b2, w3, b3 = params
    B = x.shape[0]
    k_pad, hidden = w1.shape

    # Fold concat into one matmul; zero-pad features to 128 lanes; bf16 activations.
    # (concat + cast + pad fuse into a single XLA pass producing the [B, 128] bf16 slab.)
    xa = jnp.concatenate([x, a], axis=1).astype(jnp.bfloat16)
    xa = jnp.pad(xa, ((0, 0), (0, k_pad - xa.shape[1])))

    # Batch tiling: largest tile <= tile_b that still leaves >= 2 grid steps whenever B
    # allows it, so the "parallel" batch axis can feed both v7x TensorCores.
    tile_b = _round_up(tile_b, SUBLANE)
    tb = max(SUBLANE, min(tile_b, _round_up(-(-B // 2), SUBLANE)))
    b_pad = _round_up(B, tb)
    if b_pad != B:
        xa = jnp.pad(xa, ((0, b_pad - B), (0, 0)))
    n_tiles = b_pad // tb

    const = lambda i: (0, 0)  # weights/biases stay VMEM-resident across grid steps

    # Advisory cost for XLA's scheduler around the custom call.
    flops = 2 * b_pad * (k_pad * hidden + hidden * hidden + hidden)
    bytes_accessed = (b_pad * k_pad * 2                      # xa (bf16)
                      + (k_pad + hidden) * hidden * 2        # w1, w2 (bf16)
                      + (3 * hidden + 1) * 4                 # b1, b2, w3 row, b3 (f32)
                      + b_pad * 4)                           # q output (f32)

    # VMEM budget: double-buffered xa + output blocks, f32 intermediates, weights, slack.
    # Explicit because v5e's default scoped limit is 16 MiB; capped at 48 MiB so v7x's
    # 64 MiB physical VMEM keeps double-buffer headroom.
    vmem_need = (2 * tb * k_pad * 2            # xa double-buffered (bf16)
                 + 2 * tb * LANE * 4           # output block (lane-padded in VMEM), x2
                 + 4 * tb * hidden * 4         # h1/h2 f32 intermediates (generous)
                 + 2 * (k_pad + hidden + 4) * hidden * 2  # resident weights/biases, x2
                 + (1 << 20))                  # slack
    vmem_limit = min(48 * 1024 * 1024, max(32 * 1024 * 1024, vmem_need))

    q = pl.pallas_call(
        qnetwork_kernel,
        out_shape=jax.ShapeDtypeStruct((b_pad, 1), jnp.float32),
        grid=(n_tiles,),
        in_specs=[
            pl.BlockSpec((tb, k_pad), lambda i: (i, 0)),        # xa tile (pipelined)
            pl.BlockSpec((k_pad, hidden), const),               # w1
            pl.BlockSpec((1, hidden), const),                   # b1
            pl.BlockSpec((hidden, hidden), const),              # w2
            pl.BlockSpec((1, hidden), const),                   # b2
            pl.BlockSpec((1, hidden), const),                   # w3 row (f32)
            pl.BlockSpec(memory_space=pltpu.MemorySpace.SMEM),  # b3 scalar
        ],
        out_specs=pl.BlockSpec((tb, 1), lambda i: (i, 0)),
        compiler_params=pltpu.CompilerParams(
            dimension_semantics=("parallel",),   # shard batch grid across v7x TCs
            vmem_limit_bytes=int(vmem_limit),
        ),
        cost_estimate=pl.CostEstimate(flops=flops, transcendentals=0,
                                      bytes_accessed=bytes_accessed),
    )(xa, w1, b1, w2, b2, w3, b3)

    return q[:B]


def init_params(key, obs_dim, act_dim, hidden=256):
    """torch.nn.Linear-style U(-1/sqrt(fan_in), 1/sqrt(fan_in)) init.

    Weights are stored transposed vs. torch ([in, out]); fc1/fc2 weights are bf16 with
    fc1's input dim zero-padded to 128 lanes; fc3's weight is kept as an f32 [1, H] row.
    Any code loading real PyTorch checkpoints must replicate this transpose + padding.
    """
    ks = jax.random.split(key, 6)
    in1 = obs_dim + act_dim
    k_pad = _round_up(in1, LANE)

    def u(k, shape, fan_in):
        lim = 1.0 / jnp.sqrt(jnp.float32(fan_in))
        return jax.random.uniform(k, shape, jnp.float32, -lim, lim)

    w1 = jnp.zeros((k_pad, hidden), jnp.float32).at[:in1].set(u(ks[0], (in1, hidden), in1))
    b1 = u(ks[1], (1, hidden), in1)
    w2 = u(ks[2], (hidden, hidden), hidden)
    b2 = u(ks[3], (1, hidden), hidden)
    w3 = u(ks[4], (1, hidden), hidden)      # fc3 weight stored as an f32 [1, H] row
    b3 = u(ks[5], (1, 1), hidden)
    return (w1.astype(jnp.bfloat16), b1,
            w2.astype(jnp.bfloat16), b2,
            w3, b3)


def reference_forward(x, a, params):
    """Pure-JAX reference mirroring the kernel's bf16-matmul / f32-accumulate precision."""
    w1, b1, w2, b2, w3, b3 = params
    k_pad = w1.shape[0]
    xa = jnp.concatenate([x, a], axis=1).astype(jnp.bfloat16)
    xa = jnp.pad(xa, ((0, 0), (0, k_pad - xa.shape[1])))
    h1 = jnp.maximum(jnp.dot(xa, w1, preferred_element_type=jnp.float32) + b1, 0.0)
    h2 = jnp.maximum(
        jnp.dot(h1.astype(jnp.bfloat16), w2, preferred_element_type=jnp.float32) + b2, 0.0)
    return jnp.sum(h2 * w3, axis=-1, keepdims=True) + b3


def reference_forward_f32(x, a, params):
    """Full-f32 activation reference (same bf16-stored weights) for a loose precision check."""
    w1, b1, w2, b2, w3, b3 = params
    in1 = x.shape[1] + a.shape[1]
    xa = jnp.concatenate([x, a], axis=1)
    h1 = jnp.maximum(
        jnp.dot(xa, w1[:in1].astype(jnp.float32), precision="highest") + b1, 0.0)
    h2 = jnp.maximum(
        jnp.dot(h1, w2.astype(jnp.float32), precision="highest") + b2, 0.0)
    return jnp.sum(h2 * w3, axis=-1, keepdims=True) + b3


if __name__ == "__main__":
    OBS_DIM, ACT_DIM, HIDDEN = 16, 8, 256
    key = jax.random.PRNGKey(0)
    kx, ka, kp, kx2, ka2, kx3, ka3 = jax.random.split(key, 7)
    params = init_params(kp, OBS_DIM, ACT_DIM, HIDDEN)

    # Small batch (single grid step, tile shrunk to the batch).
    B = 8
    x = jax.random.normal(kx, (B, OBS_DIM), jnp.float32)
    a = jax.random.normal(ka, (B, ACT_DIM), jnp.float32)
    q = qnetwork_forward(x, a, params)
    jax.block_until_ready(q)
    assert q.shape == (B, 1), q.shape
    assert jnp.allclose(q, reference_forward(x, a, params), atol=1e-3, rtol=1e-3), \
        "mismatch vs bf16-mirrored reference (B=8)"
    assert jnp.allclose(q, reference_forward_f32(x, a, params), atol=5e-2, rtol=5e-2), \
        "excessive bf16 precision loss vs f32 reference (B=8)"

    # Medium batch exercising a 2-step parallel grid (tb=192, padded to 384).
    B2 = 384
    x2 = jax.random.normal(kx2, (B2, OBS_DIM), jnp.float32)
    a2 = jax.random.normal(ka2, (B2, ACT_DIM), jnp.float32)
    q2 = qnetwork_forward(x2, a2, params)
    jax.block_until_ready(q2)
    assert q2.shape == (B2, 1), q2.shape
    assert jnp.allclose(q2, reference_forward(x2, a2, params), atol=1e-3, rtol=1e-3), \
        "mismatch vs bf16-mirrored reference (B=384)"
    assert jnp.allclose(q2, reference_forward_f32(x2, a2, params), atol=5e-2, rtol=5e-2), \
        "excessive bf16 precision loss vs f32 reference (B=384)"

    # Larger batch exercising bigger tiles (tb=512, 2 parallel grid steps).
    B3 = 1024
    x3 = jax.random.normal(kx3, (B3, OBS_DIM), jnp.float32)
    a3 = jax.random.normal(ka3, (B3, ACT_DIM), jnp.float32)
    q3 = qnetwork_forward(x3, a3, params)
    jax.block_until_ready(q3)
    assert q3.shape == (B3, 1), q3.shape
    assert jnp.allclose(q3, reference_forward(x3, a3, params), atol=1e-3, rtol=1e-3), \
        "mismatch vs bf16-mirrored reference (B=1024)"

    print("KERNEL_OK")
</pallas_src>

<mosaic_0001>
module attributes {stable_mosaic.version = 11 : i64} {
  func.func @qnetwork_kernel(%arg0: i32, %arg1: memref<8x128xbf16, #tpu.memory_space<vmem>>, %arg2: memref<128x256xbf16, #tpu.memory_space<vmem>>, %arg3: memref<1x256xf32, #tpu.memory_space<vmem>>, %arg4: memref<256x256xbf16, #tpu.memory_space<vmem>>, %arg5: memref<1x256xf32, #tpu.memory_space<vmem>>, %arg6: memref<1x256xf32, #tpu.memory_space<vmem>>, %arg7: memref<1x1xf32, #tpu.memory_space<smem>>, %arg8: memref<8x1xf32, #tpu.memory_space<vmem>>) attributes {dimension_semantics = [#tpu.dimension_semantics<parallel>], iteration_bounds = array<i64: 1>, scalar_prefetch = 0 : i64, scratch_operands = 0 : i64, tpu.core_type = #tpu.core_type<tc>, window_params = [{transform_indices = @transform_0, window_bounds = array<i64: 8, 128>}, {pipeline_mode = #tpu.pipeline_mode<synchronous>, transform_indices = @transform_1, window_bounds = array<i64: 128, 256>}, {pipeline_mode = #tpu.pipeline_mode<synchronous>, transform_indices = @transform_2, window_bounds = array<i64: 1, 256>}, {pipeline_mode = #tpu.pipeline_mode<synchronous>, transform_indices = @transform_3, window_bounds = array<i64: 256, 256>}, {pipeline_mode = #tpu.pipeline_mode<synchronous>, transform_indices = @transform_4, window_bounds = array<i64: 1, 256>}, {pipeline_mode = #tpu.pipeline_mode<synchronous>, transform_indices = @transform_5, window_bounds = array<i64: 1, 256>}, {transform_indices = @transform_6, window_bounds = array<i64: 1, 1>}, {transform_indices = @transform_7, window_bounds = array<i64: 8, 1>}]} {
    %c0 = arith.constant 0 : index
    %c0_0 = arith.constant 0 : index
    %0 = vector.load %arg1[%c0, %c0_0] : memref<8x128xbf16, #tpu.memory_space<vmem>>, vector<8x128xbf16>
    %c0_1 = arith.constant 0 : index
    %c0_2 = arith.constant 0 : index
    %1 = vector.load %arg2[%c0_1, %c0_2] : memref<128x256xbf16, #tpu.memory_space<vmem>>, vector<128x256xbf16>
    %cst = arith.constant dense<0.000000e+00> : vector<8x256xf32>
    %2 = tpu.matmul %0, %1, %cst {dimension_numbers = #tpu.dot_dimension_numbers<[1], [0], [0], [1], [0, 0, 1, 1], [], []>} : vector<8x128xbf16>, vector<128x256xbf16>, vector<8x256xf32> -> vector<8x256xf32>
    %c0_3 = arith.constant 0 : index
    %c0_4 = arith.constant 0 : index
    %3 = vector.load %arg3[%c0_3, %c0_4] : memref<1x256xf32, #tpu.memory_space<vmem>>, vector<1x256xf32>
    %4 = vector.broadcast %3 : vector<1x256xf32> to vector<8x256xf32>
    %5 = arith.addf %2, %4 : vector<8x256xf32>
    %cst_5 = arith.constant 0.000000e+00 : f32
    %6 = vector.broadcast %cst_5 : f32 to vector<8x256xf32>
    %7 = arith.maximumf %5, %6 : vector<8x256xf32>
    %8 = arith.truncf %7 : vector<8x256xf32> to vector<8x256xbf16>
    %c0_6 = arith.constant 0 : index
    %c0_7 = arith.constant 0 : index
    %9 = vector.load %arg4[%c0_6, %c0_7] : memref<256x256xbf16, #tpu.memory_space<vmem>>, vector<256x256xbf16>
    %cst_8 = arith.constant dense<0.000000e+00> : vector<8x256xf32>
    %10 = tpu.matmul %8, %9, %cst_8 {dimension_numbers = #tpu.dot_dimension_numbers<[1], [0], [0], [1], [0, 0, 1, 1], [], []>} : vector<8x256xbf16>, vector<256x256xbf16>, vector<8x256xf32> -> vector<8x256xf32>
    %c0_9 = arith.constant 0 : index
    %c0_10 = arith.constant 0 : index
    %11 = vector.load %arg5[%c0_9, %c0_10] : memref<1x256xf32, #tpu.memory_space<vmem>>, vector<1x256xf32>
    %12 = vector.broadcast %11 : vector<1x256xf32> to vector<8x256xf32>
    %13 = arith.addf %10, %12 : vector<8x256xf32>
    %cst_11 = arith.constant 0.000000e+00 : f32
    %14 = vector.broadcast %cst_11 : f32 to vector<8x256xf32>
    %15 = arith.maximumf %13, %14 : vector<8x256xf32>
    %c0_12 = arith.constant 0 : index
    %c0_13 = arith.constant 0 : index
    %16 = vector.load %arg6[%c0_12, %c0_13] : memref<1x256xf32, #tpu.memory_space<vmem>>, vector<1x256xf32>
    %17 = vector.broadcast %16 : vector<1x256xf32> to vector<8x256xf32>
    %18 = arith.mulf %15, %17 : vector<8x256xf32>
    %cst_14 = arith.constant dense<0.000000e+00> : vector<8xf32>
    %19 = vector.multi_reduction <add>, %18, %cst_14 [1] : vector<8x256xf32> to vector<8xf32>
    %20 = vector.shape_cast %19 : vector<8xf32> to vector<8x1xf32>
    %c0_15 = arith.constant 0 : index
    %c0_16 = arith.constant 0 : index
    %21 = memref.load %arg7[%c0_15, %c0_16] : memref<1x1xf32, #tpu.memory_space<smem>>
    %22 = vector.broadcast %21 : f32 to vector<8x1xf32>
    %23 = arith.addf %20, %22 : vector<8x1xf32>
    %c0_17 = arith.constant 0 : index
    %c0_18 = arith.constant 0 : index
    %24 = vector.load %arg8[%c0_17, %c0_18] : memref<8x1xf32, #tpu.memory_space<vmem>>, vector<8x1xf32>
    tpu.vector_store %arg8[%c0_17, %c0_18], %23 {strides = array<i32>} : memref<8x1xf32, #tpu.memory_space<vmem>>, vector<8x1xf32>,
    return
  }
  func.func @transform_0(%arg0: i32) -> (i32, i32) {
    %c0_i32 = arith.constant 0 : i32
    %c0_i32_0 = arith.constant 0 : i32
    return %arg0, %c0_i32 : i32, i32
  }
  func.func @transform_1(%arg0: i32) -> (i32, i32) {
    %c0_i32 = arith.constant 0 : i32
    %c0_i32_0 = arith.constant 0 : i32
    %c0_i32_1 = arith.constant 0 : i32
    return %c0_i32, %c0_i32_0 : i32, i32
  }
  func.func @transform_2(%arg0: i32) -> (i32, i32) {
    %c0_i32 = arith.constant 0 : i32
    %c0_i32_0 = arith.constant 0 : i32
    %c0_i32_1 = arith.constant 0 : i32
    return %c0_i32, %c0_i32_0 : i32, i32
  }
  func.func @transform_3(%arg0: i32) -> (i32, i32) {
    %c0_i32 = arith.constant 0 : i32
    %c0_i32_0 = arith.constant 0 : i32
    %c0_i32_1 = arith.constant 0 : i32
    return %c0_i32, %c0_i32_0 : i32, i32
  }
  func.func @transform_4(%arg0: i32) -> (i32, i32) {
    %c0_i32 = arith.constant 0 : i32
    %c0_i32_0 = arith.constant 0 : i32
    %c0_i32_1 = arith.constant 0 : i32
    return %c0_i32, %c0_i32_0 : i32, i32
  }
  func.func @transform_5(%arg0: i32) -> (i32, i32) {
    %c0_i32 = arith.constant 0 : i32
    %c0_i32_0 = arith.constant 0 : i32
    %c0_i32_1 = arith.constant 0 : i32
    return %c0_i32, %c0_i32_0 : i32, i32
  }
  func.func @transform_6(%arg0: i32) -> (i32, i32) {
    %c0_i32 = arith.constant 0 : i32
    %c0_i32_0 = arith.constant 0 : i32
    %c0_i32_1 = arith.constant 0 : i32
    return %c0_i32, %c0_i32_0 : i32, i32
  }
  func.func @transform_7(%arg0: i32) -> (i32, i32) {
    %c0_i32 = arith.constant 0 : i32
    %c0_i32_0 = arith.constant 0 : i32
    return %arg0, %c0_i32 : i32, i32
  }
}

</mosaic_0001>

<bundles_post_ra>
// kernel: qnetwork_forward.1
= control target key start
LH: loop header
LB: loop body
LE: loop exit
PB: predicated region body
PF: predicated region fallthrough
CT: control target
= control target key end

     0   :  { %13 = vsyncpa [#allocation4], 0  ;;  %s745_s0 = inlined_call_operand.vmem [shape: bf16[8,128], index: 0, kind: input, shape index: {}]   ;;  %s746_s1 = inlined_call_operand.hbm [shape: bf16[128,256], index: 1, kind: input, shape index: {}]   ;;  %s747_s2 = inlined_call_operand.vmem [shape: f32[1,256], index: 2, kind: input, shape index: {}]   ;;  %s748_s3 = inlined_call_operand.hbm [shape: bf16[256,256], index: 3, kind: input, shape index: {}]   ;;  %s749_s4 = inlined_call_operand.vmem [shape: f32[1,256], index: 4, kind: input, shape index: {}]   ;;  %s750_s5 = inlined_call_operand.vmem [shape: f32[1,256], index: 5, kind: input, shape index: {}]   ;;  %s751_s6 = inlined_call_operand.<no memory space> [shape: f32[1,1], index: 6, kind: input, shape index: {}]   ;;  %s752_s7 = inlined_call_operand.vmem [shape: f32[8,1], index: 7, kind: output, shape index: {}]  }
   0x1   :  { %14 = vsyncpa [#allocation6], 0  ;;  %s658_s24 = smov [#allocation3]   ;;  %s610_s28 = scalar_lea.hbm %s746_s1, 2048 }
   0x2   :  { %s22_s25 = sshll.u32 %s658_s24, 4  ;;  %p611_p0 = scmp.ne.s32.totalorder %s746_s1, %s610_s28  ;;  %s23_s25 = int_to_ptr.vmem [resolvable:$true] %s22_s25 }
   0x3   :  { %p614_p1 = scmp.lt.u32.totalorder %s610_s28, %s746_s1 }
   0x5   :  { %p616_p2 = pnand %p614_p1, %p611_p0 }
   0x7   :  { %619 = shalt.err (!%p616_p2)
}
   0x8   :  { %s620_s10 = scalar_lea.vmem %s23_s25, 2048  ;;  %p625_p4 = scmp.lt.s32.totalorder %s23_s25, %s23_s25 }
   0x9   :  { %p621_p3 = scmp.ne.s32.totalorder %s23_s25, %s620_s10  ;;  %p626_p5 = scmp.lt.s32.totalorder %s620_s10, %s620_s10 }
   0xb   :  { %p627_p6 = por %p626_p5, %p625_p4 }
   0xd   :  { %p628_p7 = pnand %p627_p6, %p621_p3 }
   0xf   :  { %631 = shalt.err (!%p628_p7)
}
  0x10   :  { %s659_s11 = smov 128   ;;  %s660_s12 = smov 8  }
  0x11   :  { %28 = dma.hbm_to_vmem [thread:$0]  %s746_s1, 2048, %s23_s25, [#allocation4], %s659_s11, %s659_s11, %s660_s12  }
  0x12   :  { %s661_s15 = smov [#allocation5]   ;;  %s632_s19 = scalar_lea.hbm %s748_s3, 4096 }
  0x13   :  { %s36_s16 = sshll.u32 %s661_s15, 4  ;;  %p633_p8 = scmp.ne.s32.totalorder %s748_s3, %s632_s19  ;;  %s37_s16 = int_to_ptr.vmem [resolvable:$true] %s36_s16 }
  0x14   :  { %p636_p9 = scmp.lt.u32.totalorder %s632_s19, %s748_s3 }
  0x16   :  { %p638_p10 = pnand %p636_p9, %p633_p8 }
  0x18   :  { %641 = shalt.err (!%p638_p10)
}
  0x19   :  { %s642_s24 = scalar_lea.vmem %s37_s16, 4096  ;;  %p647_p12 = scmp.lt.s32.totalorder %s37_s16, %s37_s16 }
  0x1a   :  { %p643_p11 = scmp.ne.s32.totalorder %s37_s16, %s642_s24  ;;  %p648_p13 = scmp.lt.s32.totalorder %s642_s24, %s642_s24 }
  0x1c   :  { %p649_p0 = por %p648_p13, %p647_p12 }
  0x1e   :  { %p650_p1 = pnand %p649_p0, %p643_p11 }
  0x20   :  { %653 = shalt.err (!%p650_p1)
}
  0x21   :  { %42 = dma.hbm_to_vmem [thread:$0]  %s748_s3, 4096, %s37_s16, [#allocation6], %s659_s11, %s659_s11, %s660_s12  }
  0x22   :  { %654 = dma.done.wait [#allocation4], 2048  }
  0x23   :  { %655 = vsyncadd [#allocation4], 4294965248 }
  0x24   :  { %656 = dma.done.wait [#allocation6], 4096  }
  0x25   :  { %657 = vsyncadd [#allocation6], 4294963200  ;;  %v662_v0 = vmov 0   ;;  %v538_v1 = vld [vmem:[#allocation3 + $0x4] ss:$8 sps:$4 sm:$0xff]   ;;  %v75_v50 = vlaneseq  ;;  %vm477_vm0 = vcmask 7168  }
  0x26   :  { %197 = vmatprep.mubr.bf16.mxu0 %v662_v0  ;;  %v540_v2 = vld [vmem:[#allocation3] ss:$8 sps:$4 sm:$0xff]   ;;  %165 = vmatprep.subr.bf16.mxu0 %v538_v1  ;;  %v541_v3 = vld [vmem:[#allocation3 + $0x14] ss:$8 sps:$4 sm:$0xff]   ;;  %v543_v4 = vld [vmem:[#allocation3 + $0x10] ss:$8 sps:$4 sm:$0xff]  }
  0x27   :  { %166 = vmatpush1.bf16.msra.mxu0 %v540_v2  ;;  %v544_v5 = vld [vmem:[#allocation3 + $0x24] ss:$8 sps:$4 sm:$0xff]   ;;  %v546_v6 = vld [vmem:[#allocation3 + $0x20] ss:$8 sps:$4 sm:$0xff]   ;;  %v547_v7 = vld [vmem:[#allocation3 + $0x34] ss:$8 sps:$4 sm:$0xff]  }
  0x28   :  { %167 = vmatprep.subr.bf16.mxu0 %v541_v3  ;;  %v549_v8 = vld [vmem:[#allocation3 + $0x30] ss:$8 sps:$4 sm:$0xff]   ;;  %v550_v9 = vld [vmem:[#allocation3 + $0x44] ss:$8 sps:$4 sm:$0xff]   ;;  %v564_v11 = vld [vmem:[#allocation5] ss:$8 sps:$4 sm:$0xff]  }
  0x29   :  { %v562_v10 = vld [vmem:[#allocation5 + $0x4] ss:$8 sps:$4 sm:$0xff]   ;;  %v565_v12 = vld [vmem:[#allocation5 + $0x14] ss:$8 sps:$4 sm:$0xff]   ;;  %v552_v13 = vld [vmem:[#allocation3 + $0x40] ss:$8 sps:$4 sm:$0xff]  }
  0x2a   :  { %414 = vmatprep.subr.bf16.mxu1 %v562_v10  ;;  %v567_v14 = vld [vmem:[#allocation5 + $0x10] ss:$8 sps:$4 sm:$0xff]   ;;  %v568_v15 = vld [vmem:[#allocation5 + $0x24] ss:$8 sps:$4 sm:$0xff]   ;;  %v553_v16 = vld [vmem:[#allocation3 + $0x54] ss:$8 sps:$4 sm:$0xff]  }
  0x2b   :  { %168 = vmatpush1.bf16.msra.mxu0 %v543_v4  ;;  %415 = vmatpush1.bf16.msra.mxu1 %v564_v11  ;;  %v555_v17 = vld [vmem:[#allocation3 + $0x50] ss:$8 sps:$4 sm:$0xff]   ;;  %v570_v18 = vld [vmem:[#allocation5 + $0x20] ss:$8 sps:$4 sm:$0xff]   ;;  %v571_v19 = vld [vmem:[#allocation5 + $0x34] ss:$8 sps:$4 sm:$0xff]  }
  0x2c   :  { %169 = vmatprep.subr.bf16.mxu0 %v544_v5  ;;  %416 = vmatprep.subr.bf16.mxu1 %v565_v12  ;;  %v556_v20 = vld [vmem:[#allocation3 + $0x64] ss:$8 sps:$4 sm:$0xff]   ;;  %v558_v21 = vld [vmem:[#allocation3 + $0x60] ss:$8 sps:$4 sm:$0xff]   ;;  %v573_v22 = vld [vmem:[#allocation5 + $0x30] ss:$8 sps:$4 sm:$0xff]  }
  0x2d   :  { %v574_v23 = vld [vmem:[#allocation5 + $0x44] ss:$8 sps:$4 sm:$0xff]   ;;  %v559_v24 = vld [vmem:[#allocation3 + $0x74] ss:$8 sps:$4 sm:$0xff]   ;;  %v561_v25 = vld [vmem:[#allocation3 + $0x70] ss:$8 sps:$4 sm:$0xff]  }
  0x2e   :  { %v576_v26 = vld [vmem:[#allocation5 + $0x40] ss:$8 sps:$4 sm:$0xff]   ;;  %v577_v27 = vld [vmem:[#allocation5 + $0x54] ss:$8 sps:$4 sm:$0xff]   ;;  %v579_v28 = vld [vmem:[#allocation5 + $0x50] ss:$8 sps:$4 sm:$0xff]  }
  0x2f   :  { %170 = vmatpush1.bf16.msra.mxu0 %v546_v6  ;;  %417 = vmatpush1.bf16.msra.mxu1 %v567_v14  ;;  %v56_v29 = vld [vmem:[%s745_s0] sm:$0xf]  ;;  %v580_v30 = vld [vmem:[#allocation5 + $0x64] ss:$8 sps:$4 sm:$0xff]   ;;  %v583_v32 = vld [vmem:[#allocation5 + $0x74] ss:$8 sps:$4 sm:$0xff]  }
  0x30   :  { %171 = vmatprep.subr.bf16.mxu0 %v547_v7  ;;  %418 = vmatprep.subr.bf16.mxu1 %v568_v15  ;;  %v582_v31 = vld [vmem:[#allocation5 + $0x60] ss:$8 sps:$4 sm:$0xff]   ;;  %v585_v33 = vld [vmem:[#allocation5 + $0x70] ss:$8 sps:$4 sm:$0xff]   ;;  %v586_v34 = vld [vmem:[#allocation5 + $0x84] ss:$8 sps:$4 sm:$0xff]  }
  0x31   :  { %v588_v35 = vld [vmem:[#allocation5 + $0x80] ss:$8 sps:$4 sm:$0xff]   ;;  %v589_v36 = vld [vmem:[#allocation5 + $0x94] ss:$8 sps:$4 sm:$0xff]   ;;  %v591_v37 = vld [vmem:[#allocation5 + $0x90] ss:$8 sps:$4 sm:$0xff]  }
  0x32   :  { %v592_v38 = vld [vmem:[#allocation5 + $0xa4] ss:$8 sps:$4 sm:$0xff]   ;;  %v594_v39 = vld [vmem:[#allocation5 + $0xa0] ss:$8 sps:$4 sm:$0xff]   ;;  %v595_v40 = vld [vmem:[#allocation5 + $0xb4] ss:$8 sps:$4 sm:$0xff]  }
  0x33   :  { %172 = vmatpush1.bf16.msra.mxu0 %v549_v8  ;;  %419 = vmatpush1.bf16.msra.mxu1 %v570_v18  ;;  %v597_v41 = vld [vmem:[#allocation5 + $0xb0] ss:$8 sps:$4 sm:$0xff]   ;;  %v598_v42 = vld [vmem:[#allocation5 + $0xc4] ss:$8 sps:$4 sm:$0xff]   ;;  %v600_v43 = vld [vmem:[#allocation5 + $0xc0] ss:$8 sps:$4 sm:$0xff]  }
  0x34   :  { %173 = vmatprep.subr.bf16.mxu0 %v550_v9  ;;  %420 = vmatprep.subr.bf16.mxu1 %v571_v19  ;;  %v601_v44 = vld [vmem:[#allocation5 + $0xd4] ss:$8 sps:$4 sm:$0xff]   ;;  %v603_v45 = vld [vmem:[#allocation5 + $0xd0] ss:$8 sps:$4 sm:$0xff]   ;;  %v604_v46 = vld [vmem:[#allocation5 + $0xe4] ss:$8 sps:$4 sm:$0xff]  }
  0x35   :  { %v606_v47 = vld [vmem:[#allocation5 + $0xe0] ss:$8 sps:$4 sm:$0xff]   ;;  %v607_v48 = vld [vmem:[#allocation5 + $0xf4] ss:$8 sps:$4 sm:$0xff]   ;;  %v609_v49 = vld [vmem:[#allocation5 + $0xf0] ss:$8 sps:$4 sm:$0xff]  }
  0x36   :  { %v76_v51 = vshrl.u32 %v75_v50, 7  ;;  %v73_v53 = vld [vmem:[%s747_s2] sm:$0x3] }
  0x37   :  { %174 = vmatpush1.bf16.msra.mxu0 %v552_v13  ;;  %421 = vmatpush1.bf16.msra.mxu1 %v573_v22  ;;  %v242_v3 = vld [vmem:[%s749_s4] sm:$0x3] }
  0x38   :  { %175 = vmatprep.subr.bf16.mxu0 %v553_v16  ;;  %422 = vmatprep.subr.bf16.mxu1 %v574_v23  ;;  %v77_v52 = vsub.s32 0, %v76_v51  ;;  %v81_v54 = vsub.s32 1, %v76_v51  ;;  %v457_v6 = vld [vmem:[%s750_s5] sm:$0x3] }
  0x3a   :  { %v78_v55 = vrot.slane %v73_v53, %v77_v52  ;;  %v82_v56 = vrot.slane %v73_v53, %v81_v54  ;;  %v247_v4 = vrot.slane %v242_v3, %v77_v52  ;;  %v251_v5 = vrot.slane %v242_v3, %v81_v54 }
  0x3b   :  { %176 = vmatpush1.bf16.msra.mxu0 %v555_v17  ;;  %423 = vmatpush1.bf16.msra.mxu1 %v576_v26  ;;  %v462_v10 = vrot.slane %v457_v6, %v77_v52  ;;  %v466_v13 = vrot.slane %v457_v6, %v81_v54 }
  0x3c   :  { %177 = vmatprep.subr.bf16.mxu0 %v556_v20  ;;  %424 = vmatprep.subr.bf16.mxu1 %v577_v27  ;;  %v475_v20 = vstv %s751_s6 }
  0x3f   :  { %178 = vmatpush1.bf16.msra.mxu0 %v558_v21  ;;  %425 = vmatpush1.bf16.msra.mxu1 %v579_v28 }
  0x40   :  { %179 = vmatprep.subr.bf16.mxu0 %v559_v24  ;;  %426 = vmatprep.subr.bf16.mxu1 %v580_v30 }
  0x43   :  { %180 = vmatpush1.bf16.msra.mxu0 %v561_v25  ;;  %427 = vmatpush1.bf16.msra.mxu1 %v582_v31 }
  0x44   :  { %428 = vmatprep.subr.bf16.mxu1 %v583_v32 }
  0x46   :  { %198 = vmatmul.mubr.bf16.vlgmr.msra.gmra.mrb[0].mxu0 %v56_v29 }
  0x47   :  { %429 = vmatpush1.bf16.msra.mxu1 %v585_v33 }
  0x48   :  { %430 = vmatprep.subr.bf16.mxu1 %v586_v34 }
  0x4b   :  { %431 = vmatpush1.bf16.msra.mxu1 %v588_v35 }
  0x4c   :  { %432 = vmatprep.subr.bf16.mxu1 %v589_v36 }
  0x4f   :  { %433 = vmatpush1.bf16.msra.mxu1 %v591_v37 }
  0x50   :  { %434 = vmatprep.subr.bf16.mxu1 %v592_v38 }
  0x53   :  { %435 = vmatpush1.bf16.msra.mxu1 %v594_v39 }
  0x54   :  { %436 = vmatprep.subr.bf16.mxu1 %v595_v40 }
  0x57   :  { %437 = vmatpush1.bf16.msra.mxu1 %v597_v41 }
  0x58   :  { %438 = vmatprep.subr.bf16.mxu1 %v598_v42 }
  0x5b   :  { %439 = vmatpush1.bf16.msra.mxu1 %v600_v43 }
  0x5c   :  { %440 = vmatprep.subr.bf16.mxu1 %v601_v44 }
  0x5f   :  { %441 = vmatpush1.bf16.msra.mxu1 %v603_v45 }
  0x60   :  { %442 = vmatprep.subr.bf16.mxu1 %v604_v46 }
  0x63   :  { %443 = vmatpush1.bf16.msra.mxu1 %v606_v47 }
  0x64   :  { %444 = vmatprep.subr.bf16.mxu1 %v607_v48 }
  0x67   :  { %445 = vmatpush1.bf16.msra.mxu1 %v609_v49 }
 0x119   :  { %v199_v57 = vpop.f32.mrb[0].mxu0 }
 0x11a   :  { %v200_v58 = vadd.f32 %v199_v57, %v78_v55  ;;  %v201_v59 = vpop.f32.mrb[1].mxu0 }
 0x11b   :  { %v202_v60 = vadd.f32 %v201_v59, %v82_v56  ;;  %v203_v61 = vpop.f32.mrb[2].mxu0 }
 0x11c   :  { %v206_v62 = vmax.f32 %v200_v58, 0.0  ;;  %v204_v63 = vpop.f32.mrb[3].mxu0 }
 0x11d   :  { %v207_v0 = vmax.f32 %v202_v60, 0.0 }
 0x11e   :  { %v208_v2 = vpack.c.bf16 %v206_v62, %v206_v62 }
 0x11f   :  { %v209_v1 = vpack.c.bf16 %v207_v0, %v207_v0 }
 0x121   :  { %446 = vmatprep.mubr.bf16.mxu1 %v209_v1 }
 0x122   :  { %447 = vmatmul.mubr.bf16.vlgmr.msra.gmra.mrb[0].mxu1 %v208_v2 }
 0x1f5   :  { %v448_v7 = vpop.f32.mrb[0].mxu1 }
 0x1f6   :  { %v449_v8 = vadd.f32 %v448_v7, %v247_v4  ;;  %v450_v9 = vpop.f32.mrb[1].mxu1 }
 0x1f7   :  { %v451_v11 = vadd.f32 %v450_v9, %v251_v5  ;;  %v452_v12 = vpop.f32.mrb[2].mxu1 }
 0x1f8   :  { %v455_v14 = vmax.f32 %v449_v8, 0.0  ;;  %v453_v15 = vpop.f32.mrb[3].mxu1 }
 0x1f9   :  { %v456_v16 = vmax.f32 %v451_v11, 0.0 }
 0x1fa   :  { %v469_v17 = vmul.f32 %v462_v10, %v455_v14 }
 0x1fb   :  { %v470_v18 = vmul.f32 %v466_v13, %v456_v16 }
 0x1fd   :  { %v471_v19 = vadd.f32 %v470_v18, %v469_v17 }
 0x1ff   :  { %472 = vadd.xlane.f32.xlu0 %v471_v19 }
 0x28c   :  { %v473_v21 = vpop.xlane.xlu0 %472 }
 0x28d   :  { %v476_v22 = vadd.f32 %v475_v20, %v473_v21 }
 0x28f   :  { %478 = vst.msk [vmem:[%s752_s7] sm:$0xff] %vm477_vm0, %v476_v22 }
 0x290   :  { %483 = vsyncpa [#allocation4], 1 }
 0x291   :  { %484 = vsyncpa [#allocation6], 1 }

</bundles_post_ra>
